<compile_context>
chip_gen: v5e
topology: v5e:2x2
jax: 0.10.0
libtpu: 0.0.40
codegen_flags: <defaults>
</compile_context>

<pallas_src>
import jax
import jax.numpy as jnp
from jax.experimental import pallas as pl
from jax.experimental.pallas import tpu as pltpu

EPS = 1e-5  # nn.InstanceNorm2d default eps (affine=False, no running stats)


def _conv_shifts(H, W):
    """Lane-roll shift for each of the 9 taps, k = (dy+1)*3 + (dx+1)."""
    HW = H * W
    return tuple((-(dy * W + dx)) % HW for dy in (-1, 0, 1) for dx in (-1, 0, 1))


def _boundary_masks(H, W):
    """(9, H*W) f32 validity masks for the 9 taps (hoisted out of the kernel)."""
    HW = H * W
    lane = jnp.arange(HW, dtype=jnp.int32)
    hh = lane // W
    ww = lane % W
    rows = []
    for dy in (-1, 0, 1):
        for dx in (-1, 0, 1):
            ok = ((hh + dy >= 0) & (hh + dy <= H - 1) &
                  (ww + dx >= 0) & (ww + dx <= W - 1))
            rows.append(ok.astype(jnp.float32))
    return jnp.stack(rows, axis=0)


def _fuse_conv_weights(w_con, b_con, w_sty, b_sty):
    """Block-diagonal fused conv weight as one lane-dense 2D slab.

    Inputs are PyTorch-layout weights (Cout, Cin, 3, 3) and biases (Cout,).
    Output is (C, 9*C + 1) f32 where column k*C + i == w[o, i, dy+1, dx+1]
    (k = (dy+1)*3 + (dx+1)); the last column holds the bias (the kernel
    appends a ones row to the im2col RHS so the bias rides the same MXU dot).
    """
    Cc = w_con.shape[0]
    Cs = w_sty.shape[0]
    C = Cc + Cs
    w = jnp.zeros((C, 3, 3, C), jnp.float32)
    w = w.at[:Cc, :, :, :Cc].set(jnp.transpose(w_con, (0, 2, 3, 1)).astype(jnp.float32))
    w = w.at[Cc:, :, :, Cc:].set(jnp.transpose(w_sty, (0, 2, 3, 1)).astype(jnp.float32))
    bias = jnp.concatenate([b_con, b_sty]).astype(jnp.float32)[:, None]
    return jnp.concatenate([w.reshape(C, 9 * C), bias], axis=1)   # (C, 9*C + 1)


def _make_kernel(H, W, Cc, Cs):
    C = Cc + Cs
    HW = H * W
    shifts = _conv_shifts(H, W)

    def kernel(x_ref, w1_ref, w2_ref, masks_ref, out_ref):
        # Weights cast once per grid step -> single-pass bf16 MXU dots.
        w1 = w1_ref[...].astype(jnp.bfloat16)          # (C, 9*C + 1)
        w2 = w2_ref[...].astype(jnp.bfloat16)
        masks = masks_ref[...]                          # (9, HW) f32, VMEM-resident
        ones_row = jnp.ones((1, HW), jnp.float32)       # folds bias into the dot
        sty_sel = jax.lax.broadcasted_iota(jnp.int32, (C, 1), 0) >= Cc

        def im2col(x):
            # x: (C, HW) f32 -> stacked RHS (9*C + 1, HW) bf16.
            cols = []
            for k, shift in enumerate(shifts):
                if shift:
                    xs = pltpu.roll(x, shift, axis=1) * masks[k:k + 1, :]
                else:
                    xs = x                               # center tap: no roll, no mask
                cols.append(xs)
            cols.append(ones_row)
            return jnp.concatenate(cols, axis=0).astype(jnp.bfloat16)

        def inorm(y):
            # Per-channel InstanceNorm over H*W (biased variance, torch default).
            mean = jnp.mean(y, axis=1, keepdims=True)
            d = y - mean
            var = jnp.mean(d * d, axis=1, keepdims=True)
            return d * jax.lax.rsqrt(var + EPS)

        def body(i, carry):
            x = x_ref[i].astype(jnp.float32)             # (C, HW)
            y = jnp.dot(w1, im2col(x), preferred_element_type=jnp.float32)
            y = jnp.maximum(inorm(y), 0.0)
            z = inorm(jnp.dot(w2, im2col(y), preferred_element_type=jnp.float32))
            z = jnp.where(sty_sel, jax.nn.sigmoid(z), z)  # sigmoid on style rows only
            out_ref[i] = z.astype(out_ref.dtype)
            return carry

        jax.lax.fori_loop(0, x_ref.shape[0], body, 0)

    return kernel


def _pick_block_batch(n, cap=8):
    """Images per grid step: amortize per-step overhead, keep >=2 grid steps."""
    divisors = [d for d in range(1, min(n, cap) + 1) if n % d == 0]
    two_step = [d for d in divisors if n // d >= 2]
    return max(two_step) if two_step else max(divisors)


def patn_block_forward(con_nchw, sty_nchw, params, *, block_batch=None):
    """Intended PATNBlock.forward (is_con_sty_concat=False). Inputs are NCHW."""
    N, Cc, H, W = con_nchw.shape
    Ns, Cs, Hs, Ws = sty_nchw.shape
    assert (N, H, W) == (Ns, Hs, Ws)
    assert con_nchw.dtype == sty_nchw.dtype
    C = Cc + Cs
    HW = H * W
    K = 9 * C + 1

    Nb = block_batch if block_batch is not None else _pick_block_batch(N)
    assert N % Nb == 0
    grid = (N // Nb,)

    # Lane-dense fused activation slab: channels on sublanes, pixels on lanes.
    x = jnp.concatenate([con_nchw.reshape(N, Cc, HW),
                         sty_nchw.reshape(N, Cs, HW)], axis=1)        # (N, C, HW)

    # Host-side packing: fused block-diagonal weights (+bias column) and masks.
    w1 = _fuse_conv_weights(params["con_w1"], params["con_b1"],
                            params["sty_w1"], params["sty_b1"])
    w2 = _fuse_conv_weights(params["con_w2"], params["con_b2"],
                            params["sty_w2"], params["sty_b2"])
    masks = _boundary_masks(H, W)

    out = pl.pallas_call(
        _make_kernel(H, W, Cc, Cs),
        out_shape=jax.ShapeDtypeStruct((N, C, HW), con_nchw.dtype),
        grid_spec=pltpu.PrefetchScalarGridSpec(
            num_scalar_prefetch=0,
            grid=grid,
            in_specs=[
                pl.BlockSpec((Nb, C, HW), lambda g: (g, 0, 0)),
                pl.BlockSpec((C, K), lambda g: (0, 0)),     # resident across grid
                pl.BlockSpec((C, K), lambda g: (0, 0)),
                pl.BlockSpec((9, HW), lambda g: (0, 0)),
            ],
            out_specs=pl.BlockSpec((Nb, C, HW), lambda g: (g, 0, 0)),
        ),
        compiler_params=pltpu.CompilerParams(
            dimension_semantics=("parallel",)),
    )(x, w1, w2, masks)

    con_out = out[:, :Cc].reshape(N, Cc, H, W)
    sty_out = out[:, Cc:].reshape(N, Cs, H, W)
    return con_out, sty_out


def init_params(key, con_channels, style_channels):
    """Deterministic PyTorch-style Conv2d init.

    Weights are in torch layout (Cout, Cin, 3, 3); biases are (Cout,)."""
    ks = jax.random.split(key, 8)

    def conv_w(k, cin, cout):
        bound = 1.0 / float((cin * 9) ** 0.5)
        return jax.random.uniform(k, (cout, cin, 3, 3), jnp.float32, -bound, bound)

    def conv_b(k, cin, cout):
        bound = 1.0 / float((cin * 9) ** 0.5)
        return jax.random.uniform(k, (cout,), jnp.float32, -bound, bound)

    cc, sc = con_channels, style_channels
    return {
        "con_w1": conv_w(ks[0], cc, cc), "con_b1": conv_b(ks[1], cc, cc),
        "con_w2": conv_w(ks[2], cc, cc), "con_b2": conv_b(ks[3], cc, cc),
        "sty_w1": conv_w(ks[4], sc, sc), "sty_b1": conv_b(ks[5], sc, sc),
        "sty_w2": conv_w(ks[6], sc, sc), "sty_b2": conv_b(ks[7], sc, sc),
    }


def _stream_ref(x_nchw, w1, b1, w2, b2, apply_sigmoid):
    """Pure-JAX reference of the same math (for the sanity check)."""
    def conv(x, w, b):
        y = jax.lax.conv_general_dilated(
            x, jnp.transpose(w, (2, 3, 1, 0)), window_strides=(1, 1),
            padding="SAME", dimension_numbers=("NCHW", "HWIO", "NCHW"),
            precision=jax.lax.Precision.HIGHEST)
        return y + b.reshape(1, -1, 1, 1)

    def inorm(y):
        m = jnp.mean(y, axis=(2, 3), keepdims=True)
        v = jnp.mean((y - m) ** 2, axis=(2, 3), keepdims=True)
        return (y - m) * jax.lax.rsqrt(v + EPS)

    y = jnp.maximum(inorm(conv(x_nchw, w1, b1)), 0.0)
    z = inorm(conv(y, w2, b2))
    return jax.nn.sigmoid(z) if apply_sigmoid else z


if __name__ == "__main__":
    con_channels, style_channels = 4, 8
    N, H, W = 8, 16, 16

    key = jax.random.PRNGKey(0)
    k_con, k_sty, k_par = jax.random.split(key, 3)
    con = jax.random.normal(k_con, (N, con_channels, H, W), jnp.float32)
    sty = jax.random.normal(k_sty, (N, style_channels, H, W), jnp.float32)
    params = init_params(k_par, con_channels, style_channels)

    con_out, sty_out = patn_block_forward(con, sty, params)
    jax.block_until_ready((con_out, sty_out))

    assert con_out.shape == (N, con_channels, H, W)
    assert sty_out.shape == (N, style_channels, H, W)

    # Sanity check vs. a pure-JAX reference (HIGHEST-precision convs).  The
    # kernel's dots run single-pass bf16 on the MXU (per perf feedback), so we
    # allow a few e-2 of slack; structural bugs would show up as O(1) errors.
    con_ref = _stream_ref(con, params["con_w1"], params["con_b1"],
                          params["con_w2"], params["con_b2"], False)
    sty_ref = _stream_ref(sty, params["sty_w1"], params["sty_b1"],
                          params["sty_w2"], params["sty_b2"], True)
    assert jnp.allclose(con_out, con_ref, atol=3e-2, rtol=3e-2)
    assert jnp.allclose(sty_out, sty_ref, atol=3e-2, rtol=3e-2)

    print("KERNEL_OK")
</pallas_src>

<mosaic_0001>
module attributes {stable_mosaic.version = 11 : i64} {
  func.func @kernel(%arg0: i32, %arg1: memref<4x12x256xf32, #tpu.memory_space<vmem>>, %arg2: memref<12x109xf32, #tpu.memory_space<vmem>>, %arg3: memref<12x109xf32, #tpu.memory_space<vmem>>, %arg4: memref<9x256xf32, #tpu.memory_space<vmem>>, %arg5: memref<4x12x256xf32, #tpu.memory_space<vmem>>) attributes {dimension_semantics = [#tpu.dimension_semantics<parallel>], iteration_bounds = array<i64: 2>, scalar_prefetch = 0 : i64, scratch_operands = 0 : i64, tpu.core_type = #tpu.core_type<tc>, window_params = [{transform_indices = @transform_0, window_bounds = array<i64: 4, 12, 256>}, {pipeline_mode = #tpu.pipeline_mode<synchronous>, transform_indices = @transform_1, window_bounds = array<i64: 12, 109>}, {pipeline_mode = #tpu.pipeline_mode<synchronous>, transform_indices = @transform_2, window_bounds = array<i64: 12, 109>}, {pipeline_mode = #tpu.pipeline_mode<synchronous>, transform_indices = @transform_3, window_bounds = array<i64: 9, 256>}, {transform_indices = @transform_4, window_bounds = array<i64: 4, 12, 256>}]} {
    %c0 = arith.constant 0 : index
    %c0_0 = arith.constant 0 : index
    %0 = vector.load %arg2[%c0, %c0_0] : memref<12x109xf32, #tpu.memory_space<vmem>>, vector<12x109xf32>
    %1 = arith.truncf %0 : vector<12x109xf32> to vector<12x109xbf16>
    %c0_1 = arith.constant 0 : index
    %c0_2 = arith.constant 0 : index
    %2 = vector.load %arg3[%c0_1, %c0_2] : memref<12x109xf32, #tpu.memory_space<vmem>>, vector<12x109xf32>
    %3 = arith.truncf %2 : vector<12x109xf32> to vector<12x109xbf16>
    %c0_3 = arith.constant 0 : index
    %c0_4 = arith.constant 0 : index
    %4 = vector.load %arg4[%c0_3, %c0_4] : memref<9x256xf32, #tpu.memory_space<vmem>>, vector<9x256xf32>
    %cst = arith.constant 1.000000e+00 : f32
    %5 = vector.broadcast %cst : f32 to vector<1x256xf32>
    %6 = tpu.iota {dimensions = array<i32: 0>} : vector<12x1xi32>
    %c4_i32 = arith.constant 4 : i32
    %7 = vector.broadcast %c4_i32 : i32 to vector<12x1xi32>
    %8 = arith.cmpi sge, %6, %7 : vector<12x1xi32>
    %c0_i32 = arith.constant 0 : i32
    %c4_i32_5 = arith.constant 4 : i32
    %9 = arith.addi %c0_i32, %c4_i32_5 : i32
    %c1_i32 = arith.constant 1 : i32
    scf.for %arg6 = %c0_i32 to %9 step %c1_i32  : i32 {
      %10 = arith.index_cast %arg6 : i32 to index
      %c0_7 = arith.constant 0 : index
      %c0_8 = arith.constant 0 : index
      %11 = vector.load %arg1[%10, %c0_7, %c0_8] : memref<4x12x256xf32, #tpu.memory_space<vmem>>, vector<1x12x256xf32>
      %12 = vector.shape_cast %11 : vector<1x12x256xf32> to vector<12x256xf32>
      %c17_i32 = arith.constant 17 : i32
      %13 = tpu.dynamic_rotate %12 by %c17_i32 dim 1 : vector<12x256xf32>, i32 -> vector<12x256xf32>
      %14 = vector.extract_strided_slice %4 {offsets = [0, 0], sizes = [1, 256], strides = [1, 1]} : vector<9x256xf32> to vector<1x256xf32>
      %15 = vector.broadcast %14 : vector<1x256xf32> to vector<12x256xf32>
      %16 = arith.mulf %13, %15 : vector<12x256xf32>
      %c16_i32 = arith.constant 16 : i32
      %17 = tpu.dynamic_rotate %12 by %c16_i32 dim 1 : vector<12x256xf32>, i32 -> vector<12x256xf32>
      %18 = vector.extract_strided_slice %4 {offsets = [1, 0], sizes = [1, 256], strides = [1, 1]} : vector<9x256xf32> to vector<1x256xf32>
      %19 = vector.broadcast %18 : vector<1x256xf32> to vector<12x256xf32>
      %20 = arith.mulf %17, %19 : vector<12x256xf32>
      %c15_i32 = arith.constant 15 : i32
      %21 = tpu.dynamic_rotate %12 by %c15_i32 dim 1 : vector<12x256xf32>, i32 -> vector<12x256xf32>
      %22 = vector.extract_strided_slice %4 {offsets = [2, 0], sizes = [1, 256], strides = [1, 1]} : vector<9x256xf32> to vector<1x256xf32>
      %23 = vector.broadcast %22 : vector<1x256xf32> to vector<12x256xf32>
      %24 = arith.mulf %21, %23 : vector<12x256xf32>
      %c1_i32_9 = arith.constant 1 : i32
      %25 = tpu.dynamic_rotate %12 by %c1_i32_9 dim 1 : vector<12x256xf32>, i32 -> vector<12x256xf32>
      %26 = vector.extract_strided_slice %4 {offsets = [3, 0], sizes = [1, 256], strides = [1, 1]} : vector<9x256xf32> to vector<1x256xf32>
      %27 = vector.broadcast %26 : vector<1x256xf32> to vector<12x256xf32>
      %28 = arith.mulf %25, %27 : vector<12x256xf32>
      %c255_i32 = arith.constant 255 : i32
      %29 = tpu.dynamic_rotate %12 by %c255_i32 dim 1 : vector<12x256xf32>, i32 -> vector<12x256xf32>
      %30 = vector.extract_strided_slice %4 {offsets = [5, 0], sizes = [1, 256], strides = [1, 1]} : vector<9x256xf32> to vector<1x256xf32>
      %31 = vector.broadcast %30 : vector<1x256xf32> to vector<12x256xf32>
      %32 = arith.mulf %29, %31 : vector<12x256xf32>
      %c241_i32 = arith.constant 241 : i32
      %33 = tpu.dynamic_rotate %12 by %c241_i32 dim 1 : vector<12x256xf32>, i32 -> vector<12x256xf32>
      %34 = vector.extract_strided_slice %4 {offsets = [6, 0], sizes = [1, 256], strides = [1, 1]} : vector<9x256xf32> to vector<1x256xf32>
      %35 = vector.broadcast %34 : vector<1x256xf32> to vector<12x256xf32>
      %36 = arith.mulf %33, %35 : vector<12x256xf32>
      %c240_i32 = arith.constant 240 : i32
      %37 = tpu.dynamic_rotate %12 by %c240_i32 dim 1 : vector<12x256xf32>, i32 -> vector<12x256xf32>
      %38 = vector.extract_strided_slice %4 {offsets = [7, 0], sizes = [1, 256], strides = [1, 1]} : vector<9x256xf32> to vector<1x256xf32>
      %39 = vector.broadcast %38 : vector<1x256xf32> to vector<12x256xf32>
      %40 = arith.mulf %37, %39 : vector<12x256xf32>
      %c239_i32 = arith.constant 239 : i32
      %41 = tpu.dynamic_rotate %12 by %c239_i32 dim 1 : vector<12x256xf32>, i32 -> vector<12x256xf32>
      %42 = vector.extract_strided_slice %4 {offsets = [8, 0], sizes = [1, 256], strides = [1, 1]} : vector<9x256xf32> to vector<1x256xf32>
      %43 = vector.broadcast %42 : vector<1x256xf32> to vector<12x256xf32>
      %44 = arith.mulf %41, %43 : vector<12x256xf32>
      %45 = tpu.concatenate %16, %20, %24, %28, %12, %32, %36, %40, %44, %5 in 0 : vector<12x256xf32>, vector<12x256xf32>, vector<12x256xf32>, vector<12x256xf32>, vector<12x256xf32>, vector<12x256xf32>, vector<12x256xf32>, vector<12x256xf32>, vector<12x256xf32>, vector<1x256xf32> -> vector<109x256xf32>
      %46 = arith.truncf %45 : vector<109x256xf32> to vector<109x256xbf16>
      %cst_10 = arith.constant dense<0.000000e+00> : vector<12x256xf32>
      %47 = tpu.matmul %1, %46, %cst_10 {dimension_numbers = #tpu.dot_dimension_numbers<[1], [0], [0], [1], [0, 0, 1, 1], [], []>} : vector<12x109xbf16>, vector<109x256xbf16>, vector<12x256xf32> -> vector<12x256xf32>
      %cst_11 = arith.constant dense<0.000000e+00> : vector<12xf32>
      %48 = vector.multi_reduction <add>, %47, %cst_11 [1] : vector<12x256xf32> to vector<12xf32>
      %49 = vector.shape_cast %48 : vector<12xf32> to vector<12x1xf32>
      %cst_12 = arith.constant 2.560000e+02 : f32
      %50 = vector.broadcast %cst_12 : f32 to vector<12x1xf32>
      %51 = arith.divf %49, %50 : vector<12x1xf32>
      %52 = vector.broadcast %51 : vector<12x1xf32> to vector<12x256xf32>
      %53 = arith.subf %47, %52 : vector<12x256xf32>
      %54 = arith.mulf %53, %53 : vector<12x256xf32>
      %cst_13 = arith.constant dense<0.000000e+00> : vector<12xf32>
      %55 = vector.multi_reduction <add>, %54, %cst_13 [1] : vector<12x256xf32> to vector<12xf32>
      %56 = vector.shape_cast %55 : vector<12xf32> to vector<12x1xf32>
      %cst_14 = arith.constant 2.560000e+02 : f32
      %57 = vector.broadcast %cst_14 : f32 to vector<12x1xf32>
      %58 = arith.divf %56, %57 : vector<12x1xf32>
      %cst_15 = arith.constant 9.99999974E-6 : f32
      %59 = vector.broadcast %cst_15 : f32 to vector<12x1xf32>
      %60 = arith.addf %58, %59 : vector<12x1xf32>
      %61 = math.rsqrt %60 : vector<12x1xf32>
      %62 = vector.broadcast %61 : vector<12x1xf32> to vector<12x256xf32>
      %63 = arith.mulf %53, %62 : vector<12x256xf32>
      %cst_16 = arith.constant 0.000000e+00 : f32
      %64 = vector.broadcast %cst_16 : f32 to vector<12x256xf32>
      %65 = arith.maximumf %63, %64 : vector<12x256xf32>
      %c17_i32_17 = arith.constant 17 : i32
      %66 = tpu.dynamic_rotate %65 by %c17_i32_17 dim 1 : vector<12x256xf32>, i32 -> vector<12x256xf32>
      %67 = vector.extract_strided_slice %4 {offsets = [0, 0], sizes = [1, 256], strides = [1, 1]} : vector<9x256xf32> to vector<1x256xf32>
      %68 = vector.broadcast %67 : vector<1x256xf32> to vector<12x256xf32>
      %69 = arith.mulf %66, %68 : vector<12x256xf32>
      %c16_i32_18 = arith.constant 16 : i32
      %70 = tpu.dynamic_rotate %65 by %c16_i32_18 dim 1 : vector<12x256xf32>, i32 -> vector<12x256xf32>
      %71 = vector.extract_strided_slice %4 {offsets = [1, 0], sizes = [1, 256], strides = [1, 1]} : vector<9x256xf32> to vector<1x256xf32>
      %72 = vector.broadcast %71 : vector<1x256xf32> to vector<12x256xf32>
      %73 = arith.mulf %70, %72 : vector<12x256xf32>
      %c15_i32_19 = arith.constant 15 : i32
      %74 = tpu.dynamic_rotate %65 by %c15_i32_19 dim 1 : vector<12x256xf32>, i32 -> vector<12x256xf32>
      %75 = vector.extract_strided_slice %4 {offsets = [2, 0], sizes = [1, 256], strides = [1, 1]} : vector<9x256xf32> to vector<1x256xf32>
      %76 = vector.broadcast %75 : vector<1x256xf32> to vector<12x256xf32>
      %77 = arith.mulf %74, %76 : vector<12x256xf32>
      %c1_i32_20 = arith.constant 1 : i32
      %78 = tpu.dynamic_rotate %65 by %c1_i32_20 dim 1 : vector<12x256xf32>, i32 -> vector<12x256xf32>
      %79 = vector.extract_strided_slice %4 {offsets = [3, 0], sizes = [1, 256], strides = [1, 1]} : vector<9x256xf32> to vector<1x256xf32>
      %80 = vector.broadcast %79 : vector<1x256xf32> to vector<12x256xf32>
      %81 = arith.mulf %78, %80 : vector<12x256xf32>
      %c255_i32_21 = arith.constant 255 : i32
      %82 = tpu.dynamic_rotate %65 by %c255_i32_21 dim 1 : vector<12x256xf32>, i32 -> vector<12x256xf32>
      %83 = vector.extract_strided_slice %4 {offsets = [5, 0], sizes = [1, 256], strides = [1, 1]} : vector<9x256xf32> to vector<1x256xf32>
      %84 = vector.broadcast %83 : vector<1x256xf32> to vector<12x256xf32>
      %85 = arith.mulf %82, %84 : vector<12x256xf32>
      %c241_i32_22 = arith.constant 241 : i32
      %86 = tpu.dynamic_rotate %65 by %c241_i32_22 dim 1 : vector<12x256xf32>, i32 -> vector<12x256xf32>
      %87 = vector.extract_strided_slice %4 {offsets = [6, 0], sizes = [1, 256], strides = [1, 1]} : vector<9x256xf32> to vector<1x256xf32>
      %88 = vector.broadcast %87 : vector<1x256xf32> to vector<12x256xf32>
      %89 = arith.mulf %86, %88 : vector<12x256xf32>
      %c240_i32_23 = arith.constant 240 : i32
      %90 = tpu.dynamic_rotate %65 by %c240_i32_23 dim 1 : vector<12x256xf32>, i32 -> vector<12x256xf32>
      %91 = vector.extract_strided_slice %4 {offsets = [7, 0], sizes = [1, 256], strides = [1, 1]} : vector<9x256xf32> to vector<1x256xf32>
      %92 = vector.broadcast %91 : vector<1x256xf32> to vector<12x256xf32>
      %93 = arith.mulf %90, %92 : vector<12x256xf32>
      %c239_i32_24 = arith.constant 239 : i32
      %94 = tpu.dynamic_rotate %65 by %c239_i32_24 dim 1 : vector<12x256xf32>, i32 -> vector<12x256xf32>
      %95 = vector.extract_strided_slice %4 {offsets = [8, 0], sizes = [1, 256], strides = [1, 1]} : vector<9x256xf32> to vector<1x256xf32>
      %96 = vector.broadcast %95 : vector<1x256xf32> to vector<12x256xf32>
      %97 = arith.mulf %94, %96 : vector<12x256xf32>
      %98 = tpu.concatenate %69, %73, %77, %81, %65, %85, %89, %93, %97, %5 in 0 : vector<12x256xf32>, vector<12x256xf32>, vector<12x256xf32>, vector<12x256xf32>, vector<12x256xf32>, vector<12x256xf32>, vector<12x256xf32>, vector<12x256xf32>, vector<12x256xf32>, vector<1x256xf32> -> vector<109x256xf32>
      %99 = arith.truncf %98 : vector<109x256xf32> to vector<109x256xbf16>
      %cst_25 = arith.constant dense<0.000000e+00> : vector<12x256xf32>
      %100 = tpu.matmul %3, %99, %cst_25 {dimension_numbers = #tpu.dot_dimension_numbers<[1], [0], [0], [1], [0, 0, 1, 1], [], []>} : vector<12x109xbf16>, vector<109x256xbf16>, vector<12x256xf32> -> vector<12x256xf32>
      %cst_26 = arith.constant dense<0.000000e+00> : vector<12xf32>
      %101 = vector.multi_reduction <add>, %100, %cst_26 [1] : vector<12x256xf32> to vector<12xf32>
      %102 = vector.shape_cast %101 : vector<12xf32> to vector<12x1xf32>
      %cst_27 = arith.constant 2.560000e+02 : f32
      %103 = vector.broadcast %cst_27 : f32 to vector<12x1xf32>
      %104 = arith.divf %102, %103 : vector<12x1xf32>
      %105 = vector.broadcast %104 : vector<12x1xf32> to vector<12x256xf32>
      %106 = arith.subf %100, %105 : vector<12x256xf32>
      %107 = arith.mulf %106, %106 : vector<12x256xf32>
      %cst_28 = arith.constant dense<0.000000e+00> : vector<12xf32>
      %108 = vector.multi_reduction <add>, %107, %cst_28 [1] : vector<12x256xf32> to vector<12xf32>
      %109 = vector.shape_cast %108 : vector<12xf32> to vector<12x1xf32>
      %cst_29 = arith.constant 2.560000e+02 : f32
      %110 = vector.broadcast %cst_29 : f32 to vector<12x1xf32>
      %111 = arith.divf %109, %110 : vector<12x1xf32>
      %cst_30 = arith.constant 9.99999974E-6 : f32
      %112 = vector.broadcast %cst_30 : f32 to vector<12x1xf32>
      %113 = arith.addf %111, %112 : vector<12x1xf32>
      %114 = math.rsqrt %113 : vector<12x1xf32>
      %115 = vector.broadcast %114 : vector<12x1xf32> to vector<12x256xf32>
      %116 = arith.mulf %106, %115 : vector<12x256xf32>
      %117 = arith.negf %116 : vector<12x256xf32>
      %118 = math.exp %117 : vector<12x256xf32>
      %cst_31 = arith.constant 1.000000e+00 : f32
      %119 = vector.broadcast %cst_31 : f32 to vector<12x256xf32>
      %120 = arith.addf %119, %118 : vector<12x256xf32>
      %121 = arith.divf %119, %120 : vector<12x256xf32>
      %122 = vector.shape_cast %8 : vector<12x1xi1> to vector<12x1xi1>
      %123 = vector.broadcast %122 : vector<12x1xi1> to vector<12x256xi1>
      %124 = arith.select %123, %121, %116 : vector<12x256xi1>, vector<12x256xf32>
      %125 = arith.index_cast %arg6 : i32 to index
      %c0_32 = arith.constant 0 : index
      %c0_33 = arith.constant 0 : index
      %126 = vector.load %arg5[%125, %c0_32, %c0_33] : memref<4x12x256xf32, #tpu.memory_space<vmem>>, vector<1x12x256xf32>
      %127 = vector.shape_cast %126 : vector<1x12x256xf32> to vector<12x256xf32>
      %128 = vector.shape_cast %124 : vector<12x256xf32> to vector<1x12x256xf32>
      tpu.vector_store %arg5[%125, %c0_32, %c0_33], %128 {strides = array<i32>} : memref<4x12x256xf32, #tpu.memory_space<vmem>>, vector<1x12x256xf32>,
    }
    %c4_i32_6 = arith.constant 4 : i32
    return
  }
  func.func @transform_0(%arg0: i32) -> (i32, i32, i32) {
    %c0_i32 = arith.constant 0 : i32
    %c0_i32_0 = arith.constant 0 : i32
    %c0_i32_1 = arith.constant 0 : i32
    return %arg0, %c0_i32, %c0_i32_0 : i32, i32, i32
  }
  func.func @transform_1(%arg0: i32) -> (i32, i32) {
    %c0_i32 = arith.constant 0 : i32
    %c0_i32_0 = arith.constant 0 : i32
    %c0_i32_1 = arith.constant 0 : i32
    return %c0_i32, %c0_i32_0 : i32, i32
  }
  func.func @transform_2(%arg0: i32) -> (i32, i32) {
    %c0_i32 = arith.constant 0 : i32
    %c0_i32_0 = arith.constant 0 : i32
    %c0_i32_1 = arith.constant 0 : i32
    return %c0_i32, %c0_i32_0 : i32, i32
  }
  func.func @transform_3(%arg0: i32) -> (i32, i32) {
    %c0_i32 = arith.constant 0 : i32
    %c0_i32_0 = arith.constant 0 : i32
    %c0_i32_1 = arith.constant 0 : i32
    return %c0_i32, %c0_i32_0 : i32, i32
  }
  func.func @transform_4(%arg0: i32) -> (i32, i32, i32) {
    %c0_i32 = arith.constant 0 : i32
    %c0_i32_0 = arith.constant 0 : i32
    %c0_i32_1 = arith.constant 0 : i32
    return %arg0, %c0_i32, %c0_i32_0 : i32, i32, i32
  }
}

</mosaic_0001>

<bundles_post_ra>
// kernel: tpu_custom_call.1
= control target key start
LH: loop header
LB: loop body
LE: loop exit
PB: predicated region body
PF: predicated region fallthrough
CT: control target
= control target key end

     0   :  { %s1164_s15 = smov 0   ;;  %s1749_s0 = inlined_call_operand.vmem [shape: f32[8,12,256], index: 0, kind: input, shape index: {}]   ;;  %s1750_s1 = inlined_call_operand.vmem [shape: f32[12,109], index: 1, kind: input, shape index: {}]   ;;  %s1751_s2 = inlined_call_operand.vmem [shape: f32[12,109], index: 2, kind: input, shape index: {}]   ;;  %s1752_s3 = inlined_call_operand.vmem [shape: f32[9,256], index: 3, kind: input, shape index: {}]   ;;  %s1753_s4 = inlined_call_operand.vmem [shape: f32[8,12,256], index: 4, kind: output, shape index: {}]  }
   0x1 LB: > { %s1033_s16 = sadd.s32 4294967295, %s1123_s15   ;;  %p1037_p0 = scmp.ge.s32.totalorder %s1123_s15, 1  ;;  %s1123_s15 = sphi %s1164_s15, %s14_s15  }
   0x2   : > { %p164_p1 = scmp.lt.s32.totalorder %s1123_s15, 3 }
   0x4   : > { %p165_p2 = pnand %p1037_p0, %p164_p1 }
   0x5   : > { %s1038_s17 = sshll.u32 (!%p165_p2), %s1033_s16, 2  ;;  %s1222_s16 = smov (!%p165_p2), 0  }
   0x6   : > { %168 = sbr.rel (%p165_p2) target bundleno = 1258 (0x4ea), region = 36  ;;  %p193_p3 = scmp.lt.s32.totalorder (!%p165_p2), %s1038_s17, 7 }
   0xb   : > { %v207_v0 = vld [vmem:[%s1750_s1] sm:$0xff]  ;;  %v208_v1 = vld [vmem:[%s1750_s1 + $0x8] sm:$0xf]  ;;  %v1754_v3 = vlaneseq  ;;  %v1201_v9 = vld [vmem:[%s1752_s3 + $0x10] sm:$0x1]  ;;  %s1757_s17 = smov (!%p193_p3, %s1038_s17), 7 }
   0xc   : > { %v210_v2 = vld [vmem:[%s1751_s2] sm:$0xff]  ;;  %v1181_v4 = vpack.c.bf16 %v208_v1, %v207_v0  ;;  %v211_v5 = vld [vmem:[%s1751_s2 + $0x8] sm:$0xf]  ;;  %v1206_v10 = vld [vmem:[%s1752_s3 + $0x18] sm:$0x1]  ;;  %s1057_s8 = sshll.u32 %s1757_s17, 5 }
   0xd   : > { %v1189_v6 = vld [vmem:[%s1752_s3] sm:$0xff]  ;;  %v1194_v7 = vld [vmem:[%s1752_s3 + $0x8] sm:$0xff]  ;;  %v1196_v8 = vpack.c.bf16 %v211_v5, %v210_v2  ;;  %v1209_v11 = vshrl.u32 %v1754_v3, 7  ;;  %s1215_s11 = scalar_lea.vmem %s1749_s0, %s1057_s8  ;;  %s1220_s14 = scalar_lea.vmem %s1753_s4, %s1057_s8 }
   0xf   : > { %vm220_vm0 = vcmp.ge.s32.totalorder %v1209_v11, 4 }
  0x10 LB: >> { %s1059_s17 = sshll.u32 %s1127_s16, 5  ;;  %s1129_s19 = smov 111   ;;  %v1755_v3 = vlaneseq  ;;  %vm474_vm1 = vcmask 1045504   ;;  %v1308_v22 = vperm.slane %v1201_v9, 0  ;;  %v1311_v23 = vperm.slane %v1206_v10, 0  ;;  %s1127_s16 = sphi %s1222_s16, %s227_s16  }
  0x11   : >> { %s230_s18 = scalar_lea.vmem %s1215_s11, %s1059_s17  ;;  %s1130_s20 = smov 112   ;;  %vm393_vm3 = vcmask 1043456   ;;  %vm475_vm4 = vcmask 1046528   ;;  %v1137_v26 = vmov 65535   ;;  %v1333_v44 = vperm.slane %v1189_v6, 7 }
  0x12   : >> { %v1231_v12 = vld [vmem:[%s230_s18 + $0x10] sm:$0xf]  ;;  %v1233_v13 = vld [vmem:[%s230_s18] sm:$0xff]  ;;  %v1241_v14 = vld [vmem:[%s230_s18 + $0x18] sm:$0xf]  ;;  %s1131_s21 = smov 113   ;;  %s1731_s27 = scalar_lea.vmem %s1220_s14, %s1059_s17 }
  0x13   : >> { %372 = vrot.lane.b32.xlu0 %v1231_v12, %s1129_s19  ;;  %370 = vrot.lane.b32.xlu1 %v1233_v13, %s1129_s19  ;;  %v1243_v15 = vld [vmem:[%s230_s18 + $0x8] sm:$0xff]  ;;  %s1132_s22 = smov 127   ;;  %s1133_s23 = smov 1   ;;  %v1304_v20 = vand.u32 127, %v1755_v3  ;;  %v476_v27 = vsel %vm474_vm1, 4294967295, %v1137_v26  ;;  %v1336_v45 = vperm.slane %v1194_v7, 7 }
  0x14   : >> { %351 = vrot.lane.b32.xlu2 %v1233_v13, %s1130_s20  ;;  %s1134_s24 = smov 15   ;;  %s1135_s25 = smov 16   ;;  %v1326_v37 = vsel %vm475_vm4, %v476_v27, 0  ;;  %v1352_v56 = vperm.slane %v1189_v6, 6  ;;  %v1355_v57 = vperm.slane %v1194_v7, 6  ;;  %v1372_v27 = vperm.slane %v1194_v7, 5 }
  0x15   : >> { %s1136_s26 = smov 17   ;;  %vm378_vm2 = vcmp.lt.s32.totalorder %v1304_v20, 111  ;;  %vm359_vm5 = vcmp.lt.s32.totalorder %v1304_v20, 112  ;;  %vm340_vm6 = vcmp.lt.s32.totalorder %v1304_v20, 113  ;;  %vm321_vm7 = vcmp.lt.s32.totalorder %v1304_v20, 127  ;;  %s227_s16 = sadd.s32 1, %s1127_s16  }
  0x16   : >> { %vm302_vm8 = vcmp.lt.s32.totalorder %v1304_v20, 1  ;;  %vm283_vm9 = vcmp.lt.s32.totalorder %v1304_v20, 15  ;;  %vm264_vm10 = vcmp.lt.s32.totalorder %v1304_v20, 16  ;;  %vm245_vm11 = vcmp.lt.s32.totalorder %v1304_v20, 17  ;;  %p224_p4 = scmp.ge.s32.totalorder %s227_s16, 4  }
  0x17   : >> { %vm470_vm12 = vcmask 891904  }
  0x1b   : >> { %376 = vrot.lane.b32.xlu0 %v1241_v14, %s1129_s19  ;;  %374 = vrot.lane.b32.xlu1 %v1243_v15, %s1129_s19 }
  0x1c   : >> { %353 = vrot.lane.b32.xlu2 %v1231_v12, %s1130_s20 }
  0x23   : >> { %355 = vrot.lane.b32.xlu0 %v1243_v15, %s1130_s20  ;;  %357 = vrot.lane.b32.xlu1 %v1241_v14, %s1130_s20 }
  0x24   : >> { %334 = vrot.lane.b32.xlu2 %v1231_v12, %s1131_s21 }
  0x2b   : >> { %338 = vrot.lane.b32.xlu0 %v1241_v14, %s1131_s21  ;;  %313 = vrot.lane.b32.xlu1 %v1233_v13, %s1132_s22 }
  0x2c   : >> { %315 = vrot.lane.b32.xlu2 %v1231_v12, %s1132_s22 }
  0x33   : >> { %317 = vrot.lane.b32.xlu0 %v1243_v15, %s1132_s22  ;;  %319 = vrot.lane.b32.xlu1 %v1241_v14, %s1132_s22 }
  0x34   : >> { %332 = vrot.lane.b32.xlu2 %v1233_v13, %s1131_s21 }
  0x3b   : >> { %336 = vrot.lane.b32.xlu0 %v1243_v15, %s1131_s21  ;;  %294 = vrot.lane.b32.xlu1 %v1233_v13, %s1133_s23 }
  0x3c   : >> { %296 = vrot.lane.b32.xlu2 %v1231_v12, %s1133_s23 }
  0x43   : >> { %298 = vrot.lane.b32.xlu0 %v1243_v15, %s1133_s23  ;;  %300 = vrot.lane.b32.xlu1 %v1241_v14, %s1133_s23 }
  0x44   : >> { %277 = vrot.lane.b32.xlu2 %v1231_v12, %s1134_s24 }
  0x4b   : >> { %281 = vrot.lane.b32.xlu0 %v1241_v14, %s1134_s24  ;;  %256 = vrot.lane.b32.xlu1 %v1233_v13, %s1135_s25 }
  0x4c   : >> { %258 = vrot.lane.b32.xlu2 %v1231_v12, %s1135_s25 }
  0x53   : >> { %260 = vrot.lane.b32.xlu0 %v1243_v15, %s1135_s25  ;;  %262 = vrot.lane.b32.xlu1 %v1241_v14, %s1135_s25 }
  0x54   : >> { %275 = vrot.lane.b32.xlu2 %v1233_v13, %s1134_s24 }
  0x5b   : >> { %279 = vrot.lane.b32.xlu0 %v1243_v15, %s1134_s24  ;;  %237 = vrot.lane.b32.xlu1 %v1231_v12, %s1136_s26 }
  0x5c   : >> { %241 = vrot.lane.b32.xlu2 %v1241_v14, %s1136_s26 }
  0x63   : >> { %235 = vrot.lane.b32.xlu0 %v1233_v13, %s1136_s26  ;;  %239 = vrot.lane.b32.xlu1 %v1243_v15, %s1136_s26 }
  0x6e   : >> { %v352_v16 = vpop.permute.xlu2 %351 }
  0x76   : >> { %v354_v17 = vpop.permute.xlu2 %353 }
  0x7e   : >> { %v335_v21 = vpop.permute.xlu2 %334 }
  0x85   : >> { %v373_v18 = vpop.permute.xlu0 %372  ;;  %v371_v19 = vpop.permute.xlu1 %370 }
  0x86   : >> { %v316_v41 = vpop.permute.xlu2 %315 }
  0x8d   : >> { %v377_v24 = vpop.permute.xlu0 %376  ;;  %v375_v25 = vpop.permute.xlu1 %374 }
  0x8e   : >> { %v380_v28 = vsel %vm378_vm2, %v373_v18, %v377_v24  ;;  %v382_v29 = vsel %vm378_vm2, %v377_v24, %v373_v18  ;;  %v379_v30 = vsel %vm378_vm2, %v371_v19, %v375_v25  ;;  %v381_v31 = vsel %vm378_vm2, %v375_v25, %v371_v19  ;;  %v333_v58 = vpop.permute.xlu2 %332 }
  0x8f   : >> { %v387_v32 = vmul.f32 %v1308_v22, %v380_v28  ;;  %v388_v33 = vmul.f32 %v1311_v23, %v382_v29  ;;  %v385_v34 = vmul.f32 %v1308_v22, %v379_v30  ;;  %v386_v35 = vmul.f32 %v1311_v23, %v381_v31 }
  0x91   : >> { %v454_v36 = vsel %vm393_vm3, %v387_v32, 1.0  ;;  %v455_v38 = vsel %vm393_vm3, %v388_v33, 1.0 }
  0x92   : >> { %v468_v39 = vpack.c.bf16 %v454_v36, %v385_v34  ;;  %v469_v40 = vpack.c.bf16 %v455_v38, %v386_v35 }
  0x94   : >> { %v479_v42 = vand.u32 %v1326_v37, %v468_v39  ;;  %v482_v43 = vand.u32 %v1326_v37, %v469_v40 }
  0x95   : >> { %v356_v46 = vpop.permute.xlu0 %355  ;;  %v358_v47 = vpop.permute.xlu1 %357 }
  0x96   : >> { %v360_v48 = vsel %vm359_vm5, %v352_v16, %v356_v46  ;;  %v362_v49 = vsel %vm359_vm5, %v356_v46, %v352_v16  ;;  %v361_v50 = vsel %vm359_vm5, %v354_v17, %v358_v47  ;;  %v363_v51 = vsel %vm359_vm5, %v358_v47, %v354_v17  ;;  %485 = vmatpush.bf16.msra.mxu0 %v479_v42  ;;  %v297_v34 = vpop.permute.xlu2 %296 }
  0x97   : >> { %499 = vmatpush.bf16.msra.mxu1 %v482_v43  ;;  %v366_v52 = vmul.f32 %v1333_v44, %v360_v48  ;;  %v367_v53 = vmul.f32 %v1336_v45, %v362_v49  ;;  %v368_v54 = vmul.f32 %v1333_v44, %v361_v50  ;;  %v369_v55 = vmul.f32 %v1336_v45, %v363_v51 }
  0x99   : >> { %v436_v59 = vrot.slane %v366_v52, 4  ;;  %v437_v60 = vrot.slane %v367_v53, 4  ;;  %v438_v61 = vrot.slane %v368_v54, 4  ;;  %v440_v62 = vrot.slane %v369_v55, 4 }
  0x9b   : >> { %v439_v17 = vsel %vm393_vm3, %v436_v59, %v438_v61  ;;  %v441_v19 = vsel %vm393_vm3, %v437_v60, %v440_v62  ;;  %v1403_v62 = vperm.slane %v1194_v7, 3 }
  0x9d   : >> { %v339_v63 = vpop.permute.xlu0 %338  ;;  %v314_v0 = vpop.permute.xlu1 %313 }
  0x9e   : >> { %v342_v1 = vsel %vm340_vm6, %v335_v21, %v339_v63  ;;  %v344_v2 = vsel %vm340_vm6, %v339_v63, %v335_v21  ;;  %v1369_v21 = vperm.slane %v1189_v6, 5  ;;  %v278_v54 = vpop.permute.xlu2 %277 }
  0x9f   : >> { %v349_v5 = vmul.f32 %v1352_v56, %v342_v1  ;;  %v350_v16 = vmul.f32 %v1355_v57, %v344_v2 }
  0xa1   : >> { %v452_v18 = vsel %vm393_vm3, %v349_v5, %v436_v59  ;;  %v453_v24 = vsel %vm393_vm3, %v350_v16, %v437_v60 }
  0xa2   : >> { %v466_v25 = vpack.c.bf16 %v439_v17, %v452_v18  ;;  %v467_v26 = vpack.c.bf16 %v441_v19, %v453_v24  ;;  %v1421_v24 = vperm.slane %v1189_v6, 2 }
  0xa4   : >> { %486 = vmatpush.bf16.msra.mxu0 %v466_v25  ;;  %500 = vmatpush.bf16.msra.mxu1 %v467_v26  ;;  %v1424_v25 = vperm.slane %v1194_v7, 2 }
  0xa5   : >> { %v318_v28 = vpop.permute.xlu0 %317  ;;  %v320_v29 = vpop.permute.xlu1 %319 }
  0xa6   : >> { %v322_v30 = vsel %vm321_vm7, %v314_v0, %v318_v28  ;;  %v324_v31 = vsel %vm321_vm7, %v318_v28, %v314_v0  ;;  %v323_v32 = vsel %vm321_vm7, %v316_v41, %v320_v29  ;;  %v325_v33 = vsel %vm321_vm7, %v320_v29, %v316_v41  ;;  %v259_v19 = vpop.permute.xlu2 %258 }
  0xa7   : >> { %v328_v35 = vmul.f32 %v1369_v21, %v322_v30  ;;  %v329_v36 = vmul.f32 %v1372_v27, %v324_v31  ;;  %v330_v38 = vmul.f32 %v1369_v21, %v323_v32  ;;  %v331_v39 = vmul.f32 %v1372_v27, %v325_v33 }
  0xa9   : >> { %v422_v40 = vrot.slane %v328_v35, 4  ;;  %v423_v42 = vrot.slane %v329_v36, 4  ;;  %v424_v43 = vrot.slane %v330_v38, 4  ;;  %v426_v46 = vrot.slane %v331_v39, 4 }
  0xab   : >> { %v425_v52 = vsel %vm393_vm3, %v422_v40, %v424_v43  ;;  %v427_v53 = vsel %vm393_vm3, %v423_v42, %v426_v46  ;;  %v450_v60 = vsel %vm393_vm3, %v1231_v12, %v422_v40  ;;  %v451_v61 = vsel %vm393_vm3, %v1241_v14, %v423_v42 }
  0xac   : >> { %v462_v1 = vpack.c.bf16 %v450_v60, %v1233_v13  ;;  %v463_v2 = vpack.c.bf16 %v451_v61, %v1243_v15 }
  0xad   : >> { %v337_v47 = vpop.permute.xlu0 %336  ;;  %v295_v48 = vpop.permute.xlu1 %294 }
  0xae   : >> { %v341_v49 = vsel %vm340_vm6, %v333_v58, %v337_v47  ;;  %v343_v41 = vsel %vm340_vm6, %v337_v47, %v333_v58  ;;  %v1400_v58 = vperm.slane %v1189_v6, 3  ;;  %v1438_v47 = vperm.slane %v1189_v6, 1 }
  0xaf   : >> { %v347_v50 = vmul.f32 %v1352_v56, %v341_v49  ;;  %v348_v51 = vmul.f32 %v1355_v57, %v343_v41  ;;  %v276_v49 = vpop.permute.xlu2 %275 }
  0xb1   : >> { %v464_v55 = vpack.c.bf16 %v347_v50, %v425_v52  ;;  %v465_v59 = vpack.c.bf16 %v348_v51, %v427_v53 }
  0xb3   : >> { %487 = vmatpush.bf16.msra.mxu0 %v464_v55  ;;  %501 = vmatpush.bf16.msra.mxu1 %v465_v59 }
  0xb5   : >> { %v299_v63 = vpop.permute.xlu0 %298  ;;  %v301_v0 = vpop.permute.xlu1 %300 }
  0xb6   : >> { %v303_v12 = vsel %vm302_vm8, %v295_v48, %v299_v63  ;;  %v305_v14 = vsel %vm302_vm8, %v299_v63, %v295_v48  ;;  %v304_v5 = vsel %vm302_vm8, %v297_v34, %v301_v0  ;;  %v306_v16 = vsel %vm302_vm8, %v301_v0, %v297_v34 }
  0xb7   : >> { %488 = vmatpush.bf16.msra.mxu0 %v462_v1  ;;  %502 = vmatpush.bf16.msra.mxu1 %v463_v2  ;;  %v309_v17 = vmul.f32 %v1400_v58, %v305_v14  ;;  %v310_v13 = vmul.f32 %v1403_v62, %v303_v12  ;;  %v311_v15 = vmul.f32 %v1400_v58, %v306_v16  ;;  %v1441_v48 = vperm.slane %v1194_v7, 1 }
  0xb8   : >> { %v312_v18 = vmul.f32 %v1403_v62, %v304_v5 }
  0xb9   : >> { %v408_v26 = vrot.slane %v309_v17, 4  ;;  %v409_v28 = vrot.slane %v310_v13, 4  ;;  %v410_v29 = vrot.slane %v311_v15, 4  ;;  %v242_v17 = vpop.permute.xlu2 %241 }
  0xba   : >> { %v412_v30 = vrot.slane %v312_v18, 4  ;;  %v1463_v18 = vperm.slane %v1189_v6, 0 }
  0xbb   : >> { %v411_v38 = vsel %vm393_vm3, %v408_v26, %v410_v29 }
  0xbc   : >> { %v413_v40 = vsel %vm393_vm3, %v409_v28, %v412_v30 }
  0xbd   : >> { %v282_v31 = vpop.permute.xlu0 %281  ;;  %v257_v32 = vpop.permute.xlu1 %256 }
  0xbe   : >> { %v285_v33 = vsel %vm283_vm9, %v278_v54, %v282_v31  ;;  %v287_v34 = vsel %vm283_vm9, %v282_v31, %v278_v54 }
  0xbf   : >> { %v292_v35 = vmul.f32 %v1421_v24, %v287_v34  ;;  %v293_v36 = vmul.f32 %v1424_v25, %v285_v33 }
  0xc1   : >> { %v448_v39 = vsel %vm393_vm3, %v292_v35, %v408_v26  ;;  %v449_v42 = vsel %vm393_vm3, %v293_v36, %v409_v28 }
  0xc2   : >> { %v460_v43 = vpack.c.bf16 %v411_v38, %v448_v39  ;;  %v461_v46 = vpack.c.bf16 %v413_v40, %v449_v42 }
  0xc4   : >> { %489 = vmatpush.bf16.msra.mxu0 %v460_v43  ;;  %503 = vmatpush.bf16.msra.mxu1 %v461_v46 }
  0xc5   : >> { %v261_v41 = vpop.permute.xlu0 %260  ;;  %v263_v50 = vpop.permute.xlu1 %262 }
  0xc6   : >> { %v265_v51 = vsel %vm264_vm10, %v257_v32, %v261_v41  ;;  %v267_v52 = vsel %vm264_vm10, %v261_v41, %v257_v32  ;;  %v266_v53 = vsel %vm264_vm10, %v259_v19, %v263_v50  ;;  %v268_v54 = vsel %vm264_vm10, %v263_v50, %v259_v19 }
  0xc7   : >> { %v271_v55 = vmul.f32 %v1438_v47, %v267_v52  ;;  %v272_v59 = vmul.f32 %v1441_v48, %v265_v51  ;;  %v273_v60 = vmul.f32 %v1438_v47, %v268_v54  ;;  %v274_v61 = vmul.f32 %v1441_v48, %v266_v53 }
  0xc8   : >> { %v1466_v19 = vperm.slane %v1194_v7, 0 }
  0xc9   : >> { %v394_v63 = vrot.slane %v271_v55, 4  ;;  %v395_v0 = vrot.slane %v272_v59, 4  ;;  %v396_v1 = vrot.slane %v273_v60, 4  ;;  %v398_v2 = vrot.slane %v274_v61, 4 }
  0xca   : >> { %v1138_v61 = vmov 256.0  }
  0xcb   : >> { %v397_v26 = vsel %vm393_vm3, %v394_v63, %v396_v1  ;;  %v399_v28 = vsel %vm393_vm3, %v395_v0, %v398_v2  ;;  %1087 = vrcp.f32 %v1138_v61 }
  0xcd   : >> { %v280_v12 = vpop.permute.xlu0 %279  ;;  %v238_v14 = vpop.permute.xlu1 %237 }
  0xce   : >> { %v284_v5 = vsel %vm283_vm9, %v276_v49, %v280_v12  ;;  %v286_v16 = vsel %vm283_vm9, %v280_v12, %v276_v49  ;;  %v247_v29 = vsel %vm245_vm11, %v238_v14, %v242_v17  ;;  %v249_v30 = vsel %vm245_vm11, %v242_v17, %v238_v14 }
  0xcf   : >> { %v290_v13 = vmul.f32 %v1421_v24, %v286_v16  ;;  %v291_v15 = vmul.f32 %v1424_v25, %v284_v5  ;;  %v254_v33 = vmul.f32 %v1463_v18, %v249_v30  ;;  %v255_v34 = vmul.f32 %v1466_v19, %v247_v29 }
  0xd1   : >> { %v458_v31 = vpack.c.bf16 %v290_v13, %v397_v26  ;;  %v459_v32 = vpack.c.bf16 %v291_v15, %v399_v28  ;;  %v446_v43 = vsel %vm393_vm3, %v254_v33, %v394_v63  ;;  %v447_v46 = vsel %vm393_vm3, %v255_v34, %v395_v0  ;;  %v1088_v63 = vpop.eup %1087 }
  0xd2   : >> { %v521_v0 = vmul.f32 256.0, %v1088_v63  ;;  %vm525_vm13 = vweird.f32 %v1088_v63 }
  0xd3   : >> { %490 = vmatpush.bf16.msra.mxu0 %v458_v31  ;;  %504 = vmatpush.bf16.msra.mxu1 %v459_v32 }
  0xd4   : >> { %v522_v1 = vsub.f32 1.0, %v521_v0 }
  0xd5   : >> { %v236_v35 = vpop.permute.xlu0 %235  ;;  %v240_v36 = vpop.permute.xlu1 %239 }
  0xd6   : >> { %v246_v38 = vsel %vm245_vm11, %v236_v35, %v240_v36  ;;  %v248_v39 = vsel %vm245_vm11, %v240_v36, %v236_v35  ;;  %v523_v2 = vmul.f32 %v1088_v63, %v522_v1 }
  0xd7   : >> { %v252_v40 = vmul.f32 %v1463_v18, %v248_v39  ;;  %v253_v42 = vmul.f32 %v1466_v19, %v246_v38 }
  0xd8   : >> { %v524_v12 = vadd.f32 %v1088_v63, %v523_v2 }
  0xd9   : >> { %v456_v49 = vpack.c.bf16 %v446_v43, %v252_v40  ;;  %v457_v41 = vpack.c.bf16 %v447_v46, %v253_v42 }
  0xda   : >> { %v1490_v14 = vsel %vm525_vm13, %v1088_v63, %v524_v12 }
  0xdb   : >> { %491 = vmatpush.bf16.msra.mxu0 %v456_v49  ;;  %505 = vmatpush.bf16.msra.mxu1 %v457_v41 }
  0xde   : >> { %1046 = vmatmul.msk.bf16.vlgmr.msra.gmra.mxu0 %vm470_vm12, %v1181_v4  ;;  %1047 = vmatmul.msk.bf16.vlgmr.msra.gmra.mxu1 %vm470_vm12, %v1181_v4 }
 0x15b   : >> { %v493_v50 = vpop.f32.mrf.mxu0  ;;  %v507_v51 = vpop.f32.mrf.mxu1 }
 0x15c   : >> { %v512_v52 = vadd.f32 %v507_v51, %v493_v50 }
 0x15e   : >> { %513 = vadd.xlane.f32.xlu0 %v512_v52 }
 0x163   : >> { %v495_v53 = vpop.f32.mrf.mxu0  ;;  %v509_v54 = vpop.f32.mrf.mxu1 }
 0x164   : >> { %v515_v55 = vsel %vm393_vm3, %v495_v53, 0.0  ;;  %v516_v59 = vsel %vm393_vm3, %v509_v54, 0.0 }
 0x165   : >> { %v517_v60 = vadd.f32 %v516_v59, %v515_v55 }
 0x167   : >> { %518 = vadd.xlane.f32.xlu2 %v517_v60 }
 0x1d1   : >> { %v514_v5 = vpop.xlane.xlu0 %513 }
 0x1d2   : >> { %v527_v16 = vmul.f32 %v1490_v14, %v514_v5 }
 0x1d4   : >> { %v529_v17 = vsub.f32 %v493_v50, %v527_v16  ;;  %v530_v13 = vsub.f32 %v507_v51, %v527_v16 }
 0x1d6   : >> { %v533_v15 = vmul.f32 %v529_v17, %v529_v17  ;;  %v534_v26 = vmul.f32 %v530_v13, %v530_v13 }
 0x1d8   : >> { %v537_v28 = vadd.f32 %v534_v26, %v533_v15 }
 0x1da   : >> { %538 = vadd.xlane.f32.xlu2 %v537_v28  ;;  %v519_v29 = vpop.xlane.xlu2 %518 }
 0x1db   : >> { %v528_v30 = vmul.f32 %v1490_v14, %v519_v29 }
 0x1dd   : >> { %v531_v31 = vsub.f32 %v495_v53, %v528_v30  ;;  %v532_v32 = vsub.f32 %v509_v54, %v528_v30 }
 0x1df   : >> { %v535_v33 = vmul.f32 %v531_v31, %v531_v31  ;;  %v536_v34 = vmul.f32 %v532_v32, %v532_v32 }
 0x1e1   : >> { %v540_v35 = vsel %vm393_vm3, %v535_v33, 0.0  ;;  %v541_v36 = vsel %vm393_vm3, %v536_v34, 0.0 }
 0x1e2   : >> { %v542_v38 = vadd.f32 %v541_v36, %v540_v35 }
 0x1e4   : >> { %543 = vadd.xlane.f32.xlu1 %v542_v38 }
 0x24d   : >> { %v539_v39 = vpop.xlane.xlu2 %538 }
 0x24e   : >> { %v545_v40 = vmul.f32 %v539_v39, %v1490_v14 }
 0x250   : >> { %v547_v42 = vadd.f32 1e-05, %v545_v40 }
 0x252   : >> { %1089 = vrsqrt.f32 %v547_v42  ;;  %vm555_vm15 = vweird.f32 %v547_v42 }
 0x257   : >> { %v544_v43 = vpop.xlane.xlu1 %543 }
 0x258   : >> { %v1090_v46 = vpop.eup %1089  ;;  %v546_v49 = vmul.f32 %v544_v43, %v1490_v14 }
 0x259   : >> { %v550_v41 = vmul.f32 %v1090_v46, %v547_v42  ;;  %vm556_vm14 = vweird.f32 %v1090_v46 }
 0x25a   : >> { %v548_v50 = vadd.f32 1e-05, %v546_v49  ;;  %vm557_vm1 = vmor %vm555_vm15, %vm556_vm14 }
 0x25b   : >> { %v551_v51 = vmul.f32 %v1090_v46, %v550_v41 }
 0x25c   : >> { %1091 = vrsqrt.f32 %v548_v50  ;;  %vm565_vm13 = vweird.f32 %v548_v50 }
 0x25d   : >> { %v552_v52 = vmul.f32 0.5, %v551_v51 }
 0x25f   : >> { %v553_v53 = vsub.f32 1.5, %v552_v52 }
 0x261   : >> { %v554_v54 = vmul.f32 %v1090_v46, %v553_v53 }
 0x262   : >> { %v1092_v55 = vpop.eup %1091 }
 0x263   : >> { %v558_v59 = vsel %vm557_vm1, %v1090_v46, %v554_v54  ;;  %v560_v63 = vmul.f32 %v1092_v55, %v548_v50  ;;  %vm566_vm4 = vweird.f32 %v1092_v55 }
 0x264   : >> { %v569_v60 = vmul.f32 %v558_v59, %v529_v17  ;;  %v570_v61 = vmul.f32 %v558_v59, %v530_v13  ;;  %vm567_vm14 = vmor %vm565_vm13, %vm566_vm4 }
 0x265   : >> { %v561_v2 = vmul.f32 %v1092_v55, %v560_v63 }
 0x266   : >> { %v1498_v0 = vmax.f32 %v569_v60, 0.0  ;;  %v1500_v1 = vmax.f32 %v570_v61, 0.0 }
 0x267   : >> { %v562_v12 = vmul.f32 0.5, %v561_v2 }
 0x268   : >> { %693 = vrot.lane.b32.xlu0 %v1500_v1, %s1129_s19  ;;  %673 = vrot.lane.b32.xlu2 %v1498_v0, %s1130_s20 }
 0x269   : >> { %689 = vrot.lane.b32.xlu1 %v1498_v0, %s1129_s19  ;;  %v563_v5 = vsub.f32 1.5, %v562_v12 }
 0x26b   : >> { %v564_v16 = vmul.f32 %v1092_v55, %v563_v5 }
 0x26d   : >> { %v568_v17 = vsel %vm567_vm14, %v1092_v55, %v564_v16 }
 0x26e   : >> { %v571_v13 = vmul.f32 %v568_v17, %v531_v31  ;;  %v572_v26 = vmul.f32 %v568_v17, %v532_v32 }
 0x270   : >> { %677 = vrot.lane.b32.xlu0 %v1500_v1, %s1130_s20  ;;  %641 = vrot.lane.b32.xlu2 %v1498_v0, %s1132_s22  ;;  %v1520_v15 = vmax.f32 %v571_v13, 0.0  ;;  %v1534_v28 = vmax.f32 %v572_v26, 0.0 }
 0x271   : >> { %657 = vrot.lane.b32.xlu1 %v1498_v0, %s1131_s21 }
 0x278   : >> { %645 = vrot.lane.b32.xlu0 %v1500_v1, %s1132_s22  ;;  %625 = vrot.lane.b32.xlu2 %v1498_v0, %s1133_s23 }
 0x279   : >> { %609 = vrot.lane.b32.xlu1 %v1498_v0, %s1134_s24 }
 0x280   : >> { %661 = vrot.lane.b32.xlu0 %v1500_v1, %s1131_s21  ;;  %593 = vrot.lane.b32.xlu2 %v1498_v0, %s1135_s25 }
 0x281   : >> { %675 = vrot.lane.b32.xlu1 %v1520_v15, %s1130_s20 }
 0x288   : >> { %629 = vrot.lane.b32.xlu0 %v1500_v1, %s1133_s23  ;;  %691 = vrot.lane.b32.xlu2 %v1520_v15, %s1129_s19 }
 0x289   : >> { %659 = vrot.lane.b32.xlu1 %v1520_v15, %s1131_s21 }
 0x290   : >> { %597 = vrot.lane.b32.xlu0 %v1500_v1, %s1135_s25  ;;  %679 = vrot.lane.b32.xlu2 %v1534_v28, %s1130_s20 }
 0x291   : >> { %643 = vrot.lane.b32.xlu1 %v1520_v15, %s1132_s22 }
 0x298   : >> { %695 = vrot.lane.b32.xlu0 %v1534_v28, %s1129_s19  ;;  %647 = vrot.lane.b32.xlu2 %v1534_v28, %s1132_s22 }
 0x299   : >> { %627 = vrot.lane.b32.xlu1 %v1520_v15, %s1133_s23 }
 0x2a0   : >> { %663 = vrot.lane.b32.xlu0 %v1534_v28, %s1131_s21  ;;  %631 = vrot.lane.b32.xlu2 %v1534_v28, %s1133_s23 }
 0x2a1   : >> { %611 = vrot.lane.b32.xlu1 %v1520_v15, %s1134_s24 }
 0x2a8   : >> { %615 = vrot.lane.b32.xlu0 %v1534_v28, %s1134_s24  ;;  %599 = vrot.lane.b32.xlu2 %v1534_v28, %s1135_s25 }
 0x2a9   : >> { %595 = vrot.lane.b32.xlu1 %v1520_v15, %s1135_s25 }
 0x2b0   : >> { %613 = vrot.lane.b32.xlu0 %v1500_v1, %s1134_s24  ;;  %579 = vrot.lane.b32.xlu2 %v1520_v15, %s1136_s26 }
 0x2b1   : >> { %583 = vrot.lane.b32.xlu1 %v1534_v28, %s1136_s26 }
 0x2b8   : >> { %577 = vrot.lane.b32.xlu0 %v1498_v0, %s1136_s26  ;;  %581 = vrot.lane.b32.xlu2 %v1500_v1, %s1136_s26 }
 0x2c2   : >> { %v674_v29 = vpop.permute.xlu2 %673 }
 0x2ca   : >> { %v642_v30 = vpop.permute.xlu2 %641 }
 0x2d2   : >> { %v1570_v31 = vpop.permute.xlu2 %625 }
 0x2da   : >> { %v694_v32 = vpop.permute.xlu0 %693  ;;  %v1574_v36 = vpop.permute.xlu2 %593 }
 0x2db   : >> { %v690_v33 = vpop.permute.xlu1 %689 }
 0x2dc   : >> { %v697_v53 = vsel %vm378_vm2, %v690_v33, %v694_v32  ;;  %v699_v55 = vsel %vm378_vm2, %v694_v32, %v690_v33 }
 0x2dd   : >> { %v701_v59 = vmul.f32 %v697_v53, %v1308_v22  ;;  %v702_v26 = vmul.f32 %v699_v55, %v1311_v23 }
 0x2e2   : >> { %v678_v34 = vpop.permute.xlu0 %677  ;;  %v692_v40 = vpop.permute.xlu2 %691 }
 0x2e3   : >> { %v1572_v35 = vpop.permute.xlu1 %657  ;;  %v681_v60 = vsel %vm359_vm5, %v674_v29, %v678_v34  ;;  %v683_v12 = vsel %vm359_vm5, %v678_v34, %v674_v29 }
 0x2e4   : >> { %v686_v55 = vmul.f32 %v683_v12, %v1336_v45 }
 0x2ea   : >> { %v646_v38 = vpop.permute.xlu0 %645  ;;  %v680_v46 = vpop.permute.xlu2 %679 }
 0x2eb   : >> { %v1576_v39 = vpop.permute.xlu1 %609  ;;  %v649_v54 = vsel %vm321_vm7, %v642_v30, %v646_v38  ;;  %v651_v32 = vsel %vm321_vm7, %v646_v38, %v642_v30 }
 0x2ec   : >> { %v653_v5 = vmul.f32 %v649_v54, %v1369_v21  ;;  %v685_v54 = vmul.f32 %v681_v60, %v1333_v44 }
 0x2ee   : >> { %v737_v38 = vrot.slane %v653_v5, 4 }
 0x2f2   : >> { %v662_v42 = vpop.permute.xlu0 %661  ;;  %v648_v50 = vpop.permute.xlu2 %647 }
 0x2f3   : >> { %v676_v43 = vpop.permute.xlu1 %675 }
 0x2f4   : >> { %v682_v61 = vsel %vm359_vm5, %v676_v43, %v680_v46  ;;  %v684_v63 = vsel %vm359_vm5, %v680_v46, %v676_v43 }
 0x2f5   : >> { %v687_v29 = vmul.f32 %v682_v61, %v1333_v44  ;;  %v688_v34 = vmul.f32 %v684_v63, %v1336_v45  ;;  %v751_v45 = vrot.slane %v685_v54, 4 }
 0x2f7   : >> { %v755_v3 = vrot.slane %v688_v34, 4 }
 0x2fa   : >> { %v630_v49 = vpop.permute.xlu0 %629  ;;  %v632_v33 = vpop.permute.xlu2 %631 }
 0x2fb   : >> { %v660_v41 = vpop.permute.xlu1 %659 }
 0x302   : >> { %v1578_v51 = vpop.permute.xlu0 %597 }
 0x303   : >> { %v644_v52 = vpop.permute.xlu1 %643 }
 0x304   : >> { %v650_v53 = vsel %vm321_vm7, %v644_v52, %v648_v50 }
 0x305   : >> { %v655_v63 = vmul.f32 %v650_v53, %v1369_v21  ;;  %v765_v21 = vsel %vm393_vm3, %v1520_v15, %v737_v38  ;;  %v633_v15 = vsel %vm302_vm8, %v1570_v31, %v630_v49  ;;  %v635_v53 = vsel %vm302_vm8, %v630_v49, %v1570_v31 }
 0x30a   : >> { %v696_v2 = vpop.permute.xlu0 %695 }
 0x30b   : >> { %v698_v16 = vsel %vm378_vm2, %v692_v40, %v696_v2  ;;  %v700_v17 = vsel %vm378_vm2, %v696_v2, %v692_v40  ;;  %v628_v13 = vpop.permute.xlu1 %627  ;;  %v652_v40 = vsel %vm321_vm7, %v648_v50, %v644_v52  ;;  %v752_v52 = vrot.slane %v686_v55, 4 }
 0x30c   : >> { %v703_v43 = vmul.f32 %v698_v16, %v1308_v22  ;;  %v704_v46 = vmul.f32 %v700_v17, %v1311_v23  ;;  %v654_v23 = vmul.f32 %v651_v32, %v1372_v27  ;;  %v656_v16 = vmul.f32 %v652_v40, %v1372_v27  ;;  %v600_v40 = vpop.permute.xlu2 %599 }
 0x30d   : >> { %v753_v17 = vrot.slane %v687_v29, 4  ;;  %v739_v27 = vrot.slane %v655_v63, 4  ;;  %v756_v34 = vsel %vm393_vm3, %v752_v52, %v755_v3  ;;  %v638_v63 = vmul.f32 %v633_v15, %v1403_v62 }
 0x30e   : >> { %v769_v30 = vsel %vm393_vm3, %v703_v43, 1.0  ;;  %v770_v22 = vsel %vm393_vm3, %v704_v46, 1.0  ;;  %v738_v12 = vrot.slane %v654_v23, 4  ;;  %v665_v46 = vsel %vm340_vm6, %v1572_v35, %v662_v42 }
 0x30f   : >> { %v783_v61 = vpack.c.bf16 %v769_v30, %v701_v59  ;;  %v784_v2 = vpack.c.bf16 %v770_v22, %v702_v26  ;;  %v741_v26 = vrot.slane %v656_v16, 4  ;;  %v754_v29 = vsel %vm393_vm3, %v751_v45, %v753_v17 }
 0x310   : >> { %v669_v22 = vmul.f32 %v665_v46, %v1352_v56  ;;  %v740_v23 = vsel %vm393_vm3, %v737_v38, %v739_v27  ;;  %v766_v31 = vsel %vm393_vm3, %v1534_v28, %v738_v12 }
 0x311   : >> { %v789_v50 = vand.u32 %v783_v61, %v1326_v37  ;;  %v792_v44 = vand.u32 %v784_v2, %v1326_v37  ;;  %v742_v61 = vsel %vm393_vm3, %v738_v12, %v741_v26  ;;  %v637_v2 = vmul.f32 %v635_v53, %v1400_v58 }
 0x312   : >> { %v664_v60 = vpop.permute.xlu0 %663  ;;  %v777_v26 = vpack.c.bf16 %v765_v21, %v1498_v0 }
 0x313   : >> { %v666_v32 = vsel %vm340_vm6, %v660_v41, %v664_v60  ;;  %v668_v59 = vsel %vm340_vm6, %v664_v60, %v660_v41  ;;  %v612_v5 = vpop.permute.xlu1 %611  ;;  %795 = vmatpush.bf16.msra.mxu2 %v789_v50  ;;  %809 = vmatpush.bf16.msra.mxu3 %v792_v44  ;;  %v667_v41 = vsel %vm340_vm6, %v662_v42, %v1572_v35 }
 0x314   : >> { %v671_v37 = vmul.f32 %v666_v32, %v1352_v56  ;;  %v672_v43 = vmul.f32 %v668_v59, %v1355_v57  ;;  %v634_v35 = vsel %vm302_vm8, %v628_v13, %v632_v33  ;;  %v636_v42 = vsel %vm302_vm8, %v632_v33, %v628_v13 }
 0x315   : >> { %v670_v49 = vmul.f32 %v667_v41, %v1355_v57  ;;  %v601_v56 = vsel %vm264_vm10, %v1574_v36, %v1578_v51  ;;  %v603_v13 = vsel %vm264_vm10, %v1578_v51, %v1574_v36  ;;  %v639_v28 = vmul.f32 %v636_v42, %v1400_v58 }
 0x316   : >> { %v767_v54 = vsel %vm393_vm3, %v671_v37, %v751_v45  ;;  %v768_v55 = vsel %vm393_vm3, %v672_v43, %v752_v52  ;;  %v640_v57 = vmul.f32 %v634_v35, %v1403_v62  ;;  %v779_v50 = vpack.c.bf16 %v669_v22, %v740_v23  ;;  %v580_v43 = vpop.permute.xlu2 %579 }
 0x317   : >> { %v781_v3 = vpack.c.bf16 %v754_v29, %v767_v54  ;;  %v782_v30 = vpack.c.bf16 %v756_v34, %v768_v55  ;;  %v780_v44 = vpack.c.bf16 %v670_v49, %v742_v61  ;;  %v723_v62 = vrot.slane %v637_v2, 4 }
 0x318   : >> { %v724_v51 = vrot.slane %v638_v63, 4  ;;  %v605_v32 = vmul.f32 %v603_v13, %v1438_v47  ;;  %v606_v59 = vmul.f32 %v601_v56, %v1441_v48  ;;  %v727_v27 = vrot.slane %v640_v57, 4 }
 0x319   : >> { %796 = vmatpush.bf16.msra.mxu2 %v781_v3  ;;  %810 = vmatpush.bf16.msra.mxu3 %v782_v30  ;;  %v778_v37 = vpack.c.bf16 %v766_v31, %v1500_v1 }
 0x31a   : >> { %v616_v33 = vpop.permute.xlu0 %615  ;;  %v709_v15 = vrot.slane %v605_v32, 4  ;;  %v710_v53 = vrot.slane %v606_v59, 4 }
 0x31b   : >> { %v618_v38 = vsel %vm283_vm9, %v612_v5, %v616_v33  ;;  %v620_v16 = vsel %vm283_vm9, %v616_v33, %v612_v5  ;;  %v596_v17 = vpop.permute.xlu1 %595  ;;  %v725_v5 = vrot.slane %v639_v28, 4 }
 0x31c   : >> { %v623_v45 = vmul.f32 %v620_v16, %v1421_v24  ;;  %v624_v52 = vmul.f32 %v618_v38, %v1424_v25  ;;  %v602_v36 = vsel %vm264_vm10, %v596_v17, %v600_v40  ;;  %v604_v58 = vsel %vm264_vm10, %v600_v40, %v596_v17 }
 0x31d   : >> { %v607_v60 = vmul.f32 %v604_v58, %v1438_v47  ;;  %v608_v12 = vmul.f32 %v602_v36, %v1441_v48  ;;  %797 = vmatpush.bf16.msra.mxu2 %v779_v50  ;;  %811 = vmatpush.bf16.msra.mxu3 %v780_v44  ;;  %v726_v48 = vsel %vm393_vm3, %v723_v62, %v725_v5 }
 0x31e   : >> { %v763_v46 = vsel %vm393_vm3, %v623_v45, %v723_v62  ;;  %v764_v41 = vsel %vm393_vm3, %v624_v52, %v724_v51  ;;  %v728_v40 = vsel %vm393_vm3, %v724_v51, %v727_v27 }
 0x31f   : >> { %v711_v29 = vrot.slane %v607_v60, 4  ;;  %v713_v34 = vrot.slane %v608_v12, 4  ;;  %v775_v54 = vpack.c.bf16 %v726_v48, %v763_v46  ;;  %v776_v55 = vpack.c.bf16 %v728_v40, %v764_v41 }
 0x321   : >> { %798 = vmatpush.bf16.msra.mxu2 %v777_v26  ;;  %812 = vmatpush.bf16.msra.mxu3 %v778_v37  ;;  %v712_v3 = vsel %vm393_vm3, %v709_v15, %v711_v29  ;;  %v714_v30 = vsel %vm393_vm3, %v710_v53, %v713_v34 }
 0x322   : >> { %v614_v47 = vpop.permute.xlu0 %613 }
 0x323   : >> { %v617_v0 = vsel %vm283_vm9, %v1576_v39, %v614_v47  ;;  %v619_v1 = vsel %vm283_vm9, %v614_v47, %v1576_v39  ;;  %v584_v21 = vpop.permute.xlu1 %583 }
 0x324   : >> { %v621_v35 = vmul.f32 %v619_v1, %v1421_v24  ;;  %v622_v42 = vmul.f32 %v617_v0, %v1424_v25  ;;  %v586_v22 = vsel %vm245_vm11, %v580_v43, %v584_v21  ;;  %v588_v23 = vsel %vm245_vm11, %v584_v21, %v580_v43  ;;  %v582_v25 = vpop.permute.xlu2 %581 }
 0x325   : >> { %799 = vmatpush.bf16.msra.mxu2 %v775_v54  ;;  %813 = vmatpush.bf16.msra.mxu3 %v776_v55  ;;  %v591_v31 = vmul.f32 %v588_v23, %v1463_v18  ;;  %v592_v24 = vmul.f32 %v586_v22, %v1466_v19 }
 0x326   : >> { %v773_v39 = vpack.c.bf16 %v621_v35, %v712_v3  ;;  %v774_v61 = vpack.c.bf16 %v622_v42, %v714_v30 }
 0x327   : >> { %v761_v28 = vsel %vm393_vm3, %v591_v31, %v709_v15  ;;  %v762_v57 = vsel %vm393_vm3, %v592_v24, %v710_v53 }
 0x329   : >> { %800 = vmatpush.bf16.msra.mxu2 %v773_v39  ;;  %814 = vmatpush.bf16.msra.mxu3 %v774_v61 }
 0x32a   : >> { %v578_v49 = vpop.permute.xlu0 %577 }
 0x32b   : >> { %v585_v2 = vsel %vm245_vm11, %v578_v49, %v582_v25  ;;  %v587_v63 = vsel %vm245_vm11, %v582_v25, %v578_v49 }
 0x32c   : >> { %v589_v56 = vmul.f32 %v587_v63, %v1463_v18  ;;  %v590_v13 = vmul.f32 %v585_v2, %v1466_v19 }
 0x32e   : >> { %v771_v33 = vpack.c.bf16 %v761_v28, %v589_v56  ;;  %v772_v38 = vpack.c.bf16 %v762_v57, %v590_v13 }
 0x330   : >> { %801 = vmatpush.bf16.msra.mxu2 %v771_v33  ;;  %815 = vmatpush.bf16.msra.mxu3 %v772_v38 }
 0x333   : >> { %1048 = vmatmul.msk.bf16.vlgmr.msra.gmra.mxu2 %vm470_vm12, %v1196_v8  ;;  %1049 = vmatmul.msk.bf16.vlgmr.msra.gmra.mxu3 %vm470_vm12, %v1196_v8 }
 0x3b6   : >> { %v803_v20 = vpop.f32.mrf.mxu2  ;;  %v817_v16 = vpop.f32.mrf.mxu3 }
 0x3b7   : >> { %v822_v17 = vadd.f32 %v817_v16, %v803_v20 }
 0x3b9   : >> { %823 = vadd.xlane.f32.xlu1 %v822_v17 }
 0x3be   : >> { %v805_v18 = vpop.f32.mrf.mxu2  ;;  %v819_v19 = vpop.f32.mrf.mxu3 }
 0x3bf   : >> { %v825_v50 = vsel %vm393_vm3, %v805_v18, 0.0  ;;  %v826_v44 = vsel %vm393_vm3, %v819_v19, 0.0 }
 0x3c0   : >> { %v827_v45 = vadd.f32 %v826_v44, %v825_v50 }
 0x3c2   : >> { %828 = vadd.xlane.f32.xlu0 %v827_v45 }
 0x42c   : >> { %v824_v52 = vpop.xlane.xlu1 %823 }
 0x42d   : >> { %v830_v36 = vmul.f32 %v824_v52, %v1490_v14 }
 0x42f   : >> { %v832_v58 = vsub.f32 %v803_v20, %v830_v36  ;;  %v833_v62 = vsub.f32 %v817_v16, %v830_v36 }
 0x431   : >> { %v836_v51 = vmul.f32 %v832_v58, %v832_v58  ;;  %v837_v60 = vmul.f32 %v833_v62, %v833_v62 }
 0x433   : >> { %v840_v12 = vadd.f32 %v837_v60, %v836_v51 }
 0x435   : >> { %841 = vadd.xlane.f32.xlu2 %v840_v12  ;;  %v829_v32 = vpop.xlane.xlu0 %828 }
 0x436   : >> { %v831_v59 = vmul.f32 %v829_v32, %v1490_v14 }
 0x438   : >> { %v834_v5 = vsub.f32 %v805_v18, %v831_v59  ;;  %v835_v27 = vsub.f32 %v819_v19, %v831_v59 }
 0x43a   : >> { %v838_v26 = vmul.f32 %v834_v5, %v834_v5  ;;  %v839_v37 = vmul.f32 %v835_v27, %v835_v27 }
 0x43c   : >> { %v843_v43 = vsel %vm393_vm3, %v838_v26, 0.0  ;;  %v844_v46 = vsel %vm393_vm3, %v839_v37, 0.0 }
 0x43d   : >> { %v845_v41 = vadd.f32 %v844_v46, %v843_v43 }
 0x43f   : >> { %846 = vadd.xlane.f32.xlu1 %v845_v41 }
 0x4a8   : >> { %v842_v29 = vpop.xlane.xlu2 %841 }
 0x4a9   : >> { %v848_v34 = vmul.f32 %v842_v29, %v1490_v14 }
 0x4ab   : >> { %v850_v15 = vadd.f32 1e-05, %v848_v34 }
 0x4ad   : >> { %1093 = vrsqrt.f32 %v850_v15  ;;  %vm858_vm3 = vweird.f32 %v850_v15 }
 0x4b2   : >> { %v847_v53 = vpop.xlane.xlu1 %846 }
 0x4b3   : >> { %v1094_v47 = vpop.eup %1093  ;;  %v849_v48 = vmul.f32 %v847_v53, %v1490_v14 }
 0x4b4   : >> { %v853_v40 = vmul.f32 %v1094_v47, %v850_v15  ;;  %vm859_vm2 = vweird.f32 %v1094_v47 }
 0x4b5   : >> { %v851_v0 = vadd.f32 1e-05, %v849_v48  ;;  %vm860_vm5 = vmor %vm858_vm3, %vm859_vm2 }
 0x4b6   : >> { %v854_v1 = vmul.f32 %v1094_v47, %v853_v40 }
 0x4b7   : >> { %1095 = vrsqrt.f32 %v851_v0  ;;  %vm868_vm7 = vweird.f32 %v851_v0 }
 0x4b8   : >> { %v855_v21 = vmul.f32 0.5, %v854_v1 }
 0x4ba   : >> { %v856_v54 = vsub.f32 1.5, %v855_v21 }
 0x4bc   : >> { %v857_v55 = vmul.f32 %v1094_v47, %v856_v54 }
 0x4bd   : >> { %v1096_v35 = vpop.eup %1095 }
 0x4be   : >> { %v861_v42 = vsel %vm860_vm5, %v1094_v47, %v857_v55  ;;  %v863_v3 = vmul.f32 %v1096_v35, %v851_v0  ;;  %vm869_vm6 = vweird.f32 %v1096_v35 }
 0x4bf   : >> { %v1722_v30 = vmul.f32 %v861_v42, %v832_v58  ;;  %v1724_v22 = vmul.f32 %v861_v42, %v833_v62  ;;  %vm870_vm8 = vmor %vm868_vm7, %vm869_vm6 }
 0x4c0   : >> { %v864_v23 = vmul.f32 %v1096_v35, %v863_v3 }
 0x4c1   : >> { %v1050_v14 = vmul.f32 -1.442695, %v1722_v30  ;;  %v1051_v39 = vmul.f32 -1.442695, %v1724_v22 }
 0x4c2   : >> { %v865_v61 = vmul.f32 0.5, %v864_v23 }
 0x4c3   : >> { %1097 = vpow2.f32 %v1050_v14 }
 0x4c4   : >> { %1099 = vpow2.f32 %v1051_v39  ;;  %v866_v31 = vsub.f32 1.5, %v865_v61 }
 0x4c6   : >> { %v867_v24 = vmul.f32 %v1096_v35, %v866_v31 }
 0x4c8   : >> { %v871_v25 = vsel %vm870_vm8, %v1096_v35, %v867_v24 }
 0x4c9   : >> { %v1098_v49 = vpop.eup %1097  ;;  %v874_v2 = vmul.f32 %v871_v25, %v834_v5  ;;  %v875_v63 = vmul.f32 %v871_v25, %v835_v27 }
 0x4ca   : >> { %v1100_v56 = vpop.eup %1099  ;;  %v888_v13 = vadd.f32 1.0, %v1098_v49 }
 0x4cb   : >> { %v889_v28 = vadd.f32 1.0, %v1100_v56  ;;  %v1052_v57 = vmul.f32 -1.442695, %v874_v2  ;;  %v1053_v33 = vmul.f32 -1.442695, %v875_v63 }
 0x4cc   : >> { %1101 = vrcp.f32 %v888_v13  ;;  %v901_v45 = vand.u32 2147483647, %v888_v13  ;;  %v903_v52 = vand.u32 2147483648, %v888_v13  ;;  %vm897_vm11 = vweird.f32 %v888_v13 }
 0x4cd   : >> { %1103 = vrcp.f32 %v889_v28  ;;  %v918_v51 = vand.u32 2147483648, %v889_v28  ;;  %v916_v12 = vand.u32 2147483647, %v889_v28  ;;  %vm912_vm15 = vweird.f32 %v889_v28 }
 0x4ce   : >> { %1105 = vpow2.f32 %v1052_v57  ;;  %v904_v59 = vor.u32 1.1754944e-38, %v903_v52  ;;  %vm902_vm1 = vcmp.eq.f32.partialorder %v901_v45, 8.507059e+37 }
 0x4cf   : >> { %1107 = vpow2.f32 %v1053_v33  ;;  %v919_v26 = vor.u32 1.1754944e-38, %v918_v51  ;;  %vm917_vm13 = vcmp.eq.f32.partialorder %v916_v12, 8.507059e+37 }
 0x4d2   : >> { %v1102_v38 = vpop.eup %1101 }
 0x4d3   : >> { %v1104_v20 = vpop.eup %1103  ;;  %v893_v16 = vmul.f32 %v1102_v38, %v888_v13  ;;  %vm898_vm9 = vweird.f32 %v1102_v38 }
 0x4d4   : >> { %v1106_v17 = vpop.eup %1105  ;;  %v908_v18 = vmul.f32 %v1104_v20, %v889_v28  ;;  %vm913_vm10 = vweird.f32 %v1104_v20  ;;  %vm899_vm12 = vmor %vm897_vm11, %vm898_vm9 }
 0x4d5   : >> { %v1108_v19 = vpop.eup %1107  ;;  %v894_v50 = vsub.f32 1.0, %v893_v16  ;;  %v890_v44 = vadd.f32 1.0, %v1106_v17  ;;  %vm914_vm4 = vmor %vm912_vm15, %vm913_vm10 }
 0x4d6   : >> { %v909_v36 = vsub.f32 1.0, %v908_v18  ;;  %v891_v58 = vadd.f32 1.0, %v1108_v19 }
 0x4d7   : >> { %v895_v62 = vmul.f32 %v1102_v38, %v894_v50  ;;  %1109 = vrcp.f32 %v890_v44  ;;  %v933_v40 = vand.u32 2147483648, %v890_v44  ;;  %v931_v21 = vand.u32 2147483647, %v890_v44 }
 0x4d8   : >> { %v910_v60 = vmul.f32 %v1104_v20, %v909_v36  ;;  %1111 = vrcp.f32 %v891_v58  ;;  %v948_v54 = vand.u32 2147483648, %v891_v58  ;;  %v946_v35 = vand.u32 2147483647, %v891_v58 }
 0x4d9   : >> { %v896_v32 = vadd.f32 %v1102_v38, %v895_v62  ;;  %vm927_vm3 = vweird.f32 %v890_v44  ;;  %v934_v3 = vor.u32 1.1754944e-38, %v933_v40  ;;  %vm942_vm6 = vweird.f32 %v891_v58 }
 0x4da   : >> { %v911_v5 = vadd.f32 %v1104_v20, %v910_v60  ;;  %vm932_vm7 = vcmp.eq.f32.partialorder %v931_v21, 8.507059e+37  ;;  %v949_v23 = vor.u32 1.1754944e-38, %v948_v54  ;;  %vm947_vm9 = vcmp.eq.f32.partialorder %v946_v35, 8.507059e+37 }
 0x4db   : >> { %v900_v27 = vsel %vm899_vm12, %v1102_v38, %v896_v32 }
 0x4dc   : >> { %v905_v37 = vsel %vm902_vm1, %v904_v59, %v900_v27  ;;  %v915_v43 = vsel %vm914_vm4, %v1104_v20, %v911_v5 }
 0x4dd   : >> { %v1110_v46 = vpop.eup %1109  ;;  %v920_v41 = vsel %vm917_vm13, %v919_v26, %v915_v43  ;;  %v956_v29 = vsel %vm220_vm0, %v905_v37, %v1722_v30 }
 0x4de   : >> { %v1112_v34 = vpop.eup %1111  ;;  %v957_v15 = vsel %vm220_vm0, %v920_v41, %v1724_v22  ;;  %962 = vst [vmem:[%s1731_s27] sm:$0xff] %v956_v29  ;;  %v923_v53 = vmul.f32 %v1110_v46, %v890_v44  ;;  %vm928_vm14 = vweird.f32 %v1110_v46 }
 0x4df   : >> { %963 = vst [vmem:[%s1731_s27 + $0x8] sm:$0xff] %v957_v15  ;;  %v938_v47 = vmul.f32 %v1112_v34, %v891_v58  ;;  %vm943_vm2 = vweird.f32 %v1112_v34  ;;  %vm929_vm5 = vmor %vm927_vm3, %vm928_vm14 }
 0x4e0   : >> { %v924_v48 = vsub.f32 1.0, %v923_v53  ;;  %vm944_vm8 = vmor %vm942_vm6, %vm943_vm2 }
 0x4e1   : >> { %v939_v0 = vsub.f32 1.0, %v938_v47 }
 0x4e2   : >> { %v925_v1 = vmul.f32 %v1110_v46, %v924_v48 }
 0x4e3   : >> { %v940_v55 = vmul.f32 %v1112_v34, %v939_v0 }
 0x4e4   : >> { %v926_v42 = vadd.f32 %v1110_v46, %v925_v1 }
 0x4e5   : >> { %v941_v30 = vadd.f32 %v1112_v34, %v940_v55  ;;  %226 = sbr.rel (!%p224_p4) target bundleno = 16 (0x10), region = 75 }
 0x4e6   : >> { %v930_v22 = vsel %vm929_vm5, %v1110_v46, %v926_v42 }
 0x4e7   : >> { %v935_v14 = vsel %vm932_vm7, %v934_v3, %v930_v22  ;;  %v945_v39 = vsel %vm944_vm8, %v1112_v34, %v941_v30 }
 0x4e8   : >> { %v950_v61 = vsel %vm947_vm9, %v949_v23, %v945_v39  ;;  %964 = vst [vmem:[%s1731_s27 + $0x10] sm:$0xf] %v935_v14 }
 0x4e9   : >> { %965 = vst [vmem:[%s1731_s27 + $0x18] sm:$0xf] %v950_v61 }
 0x4ea PF: > { %s14_s15 = sadd.s32 1, %s1123_s15  }
 0x4eb   : > { %p11_p5 = scmp.ge.s32.totalorder %s14_s15, 4  }
 0x4ed   :  { %13 = sbr.rel (!%p11_p5) target bundleno = 1 (0x1), region = 86 }

</bundles_post_ra>
